<compile_context>
chip_gen: v5e
topology: v5e:2x2
jax: 0.10.0
libtpu: 0.0.40
codegen_flags: <defaults>
</compile_context>

<pallas_src>
import functools

import jax
import jax.numpy as jnp
from jax.experimental import pallas as pl
from jax.experimental.pallas import tpu as pltpu


# ----------------------------- Pallas kernel ------------------------------ #

def _ccl_kernel(perm_ref, f_ref, fneg_ref, c_ref, cneg_ref, out_ref, *,
                hw, pointwise):
    """Per-sample partial statistics for the pos_intra and neg_inter banks.

    f_ref, fneg_ref : (C, HW) raw features  (channels on sublanes, HW on lanes)
    c_ref, cneg_ref : (K, HW) raw cluster probabilities
    out_ref         : (8, HW) lane-wise partial sums
                      rows 0-3 = pos bank, rows 4-7 = neg bank; per bank:
                        0: per-column sums of fd*cd      (trace identity)
                        1: per-row means of fd           (rank-1 identity)
                        2: per-row sums  of cd           (rank-1 identity)
                        3: row_mean * cd_rowsum          (pointwise correction)
    perm_ref        : SMEM permutation; consumed only by the index_maps.
    """
    del perm_ref  # used only by the BlockSpec index_maps

    inv_hw = 1.0 / hw

    def l2norm(x):
        # F.normalize(x, dim=channel, eps=1e-10) == x * rsqrt(max(|x|^2, eps^2))
        sq = jnp.sum(x * x, axis=0, keepdims=True)            # (1, HW)
        return x * jax.lax.rsqrt(jnp.maximum(sq, 1e-20))

    fn = l2norm(f_ref[...])          # (C, HW)
    fnegn = l2norm(fneg_ref[...])    # (C, HW)
    cn = l2norm(c_ref[...])          # (K, HW)
    cnegn = l2norm(cneg_ref[...])    # (K, HW)

    # Lane sums of each normalized operand (one cross-lane reduce each).
    s_f = jnp.sum(fn, axis=1, keepdims=True)        # (C, 1)
    s_fneg = jnp.sum(fnegn, axis=1, keepdims=True)  # (C, 1)
    s_c = jnp.sum(cn, axis=1, keepdims=True)        # (K, 1)
    s_cneg = jnp.sum(cnegn, axis=1, keepdims=True)  # (K, 1)

    # H[c, k] = sum_p fn[c, p] * cn[k, p].  Shared by both banks (f1 = fn and
    # c1 = cn in both helper() calls); contraction depth = HW (MXU-shaped).
    H = jnp.einsum('cp,kp->ck', fn, cn,
                   preferred_element_type=jnp.float32)         # (C, K)

    def bank(f2n, c2n, s_f2, s_c2):
        # Hc = H @ c2n
        Hc = jnp.einsum('ck,kq->cq', H, c2n,
                        preferred_element_type=jnp.float32)    # (C, HW)
        # sum_p fd[p,q]*cd[p,q] = sum_c f2n[c,q] * (s_f[c] - Hc[c,q])
        prod = jnp.sum(f2n * (s_f - Hc), axis=0, keepdims=True)       # (1, HW)
        # sum_q cd[p,q] = HW - sum_k cn[k,p] * (sum_q c2n[k,q])
        cd_rowsum = hw - jnp.sum(cn * s_c2, axis=0, keepdims=True)    # (1, HW)
        if pointwise:
            # mean_q fd[p,q] = (1/HW) * sum_c fn[c,p] * (sum_q f2n[c,q])
            row_mean = inv_hw * jnp.sum(fn * s_f2, axis=0, keepdims=True)
            corr = row_mean * cd_rowsum
        else:
            row_mean = jnp.zeros_like(prod)
            corr = jnp.zeros_like(prod)
        return prod, row_mean, cd_rowsum, corr

    p0, p1, p2, p3 = bank(fn, cn, s_f, s_c)
    n0, n1, n2, n3 = bank(fnegn, cnegn, s_fneg, s_cneg)

    # Single full (8, HW) lane-dense store (unmasked, (8,128)-aligned).
    out_ref[...] = jnp.concatenate([p0, p1, p2, p3, n0, n1, n2, n3], axis=0)


def _ccl_partial_sums(f, c, perm_neg, *, pointwise):
    """f: (N, C, HW); c: (N, K, HW); perm_neg: (N,) int32 -> (N, 8, HW)."""
    N, C, HW = f.shape
    K = c.shape[1]
    kernel = functools.partial(_ccl_kernel, hw=HW, pointwise=pointwise)
    # TODO(synk): for K not a multiple of 8 the cluster blocks carry sublane
    # padding in VMEM; padding K in HBM would cost an extra pass, so we accept
    # the (minor) waste here.
    return pl.pallas_call(
        kernel,
        out_shape=jax.ShapeDtypeStruct((N, 8, HW), jnp.float32),
        grid_spec=pltpu.PrefetchScalarGridSpec(
            num_scalar_prefetch=1,
            grid=(N,),
            in_specs=[
                pl.BlockSpec((None, C, HW), lambda g, perm: (g, 0, 0)),
                pl.BlockSpec((None, C, HW), lambda g, perm: (perm[g], 0, 0)),
                pl.BlockSpec((None, K, HW), lambda g, perm: (g, 0, 0)),
                pl.BlockSpec((None, K, HW), lambda g, perm: (perm[g], 0, 0)),
            ],
            out_specs=pl.BlockSpec((None, 8, HW), lambda g, perm: (g, 0, 0)),
        ),
        # Disjoint per-step output blocks -> no accumulator race; 'parallel'
        # lets v7x megacore split the batch, no-op on v5e/v6e.
        compiler_params=pltpu.CompilerParams(
            dimension_semantics=("parallel",)),
    )(perm_neg, f, f, c, c)


# ------------------------------ Python glue ------------------------------- #

def super_perm(size, key):
    """Deterministic JAX port of torch super_perm (fixed-point-free permutation)."""
    perm = jax.random.permutation(key, size)
    ar = jnp.arange(size)
    perm = jnp.where(perm == ar, perm + 1, perm)
    return perm % size


@functools.partial(jax.jit, static_argnames=("pointwise",))
def contrastive_correlation_loss(orig_feats, cluster_probs, perm_neg,
                                 pos_intra_shift, neg_inter_shift,
                                 pointwise=True):
    """orig_feats: (N, C, H, W) f32; cluster_probs: (N, K, H, W) f32 (NCHW)."""
    N, C, H, W = orig_feats.shape
    K = cluster_probs.shape[1]
    HW = H * W

    # NCHW -> (N, C, HW): free reshape (no transpose); HW is the lane axis.
    f = orig_feats.reshape(N, C, HW)
    c = cluster_probs.reshape(N, K, HW)
    perm_neg = perm_neg.astype(jnp.int32)

    parts = _ccl_partial_sums(f, c, perm_neg, pointwise=pointwise)  # (N, 8, HW)
    s = jnp.sum(parts, axis=(0, 2))                                  # (8,)

    T = float(N) * HW * HW

    def finish(prod_sum, rowmean_sum, cd_sum, corr_sum, shift):
        cd_mean = cd_sum / T
        if pointwise:
            old_mean = HW * rowmean_sum / T            # = mean(fd)
            # loss.mean() = mean(fd_rc*cd) + (old_mean - m2 - shift)*mean(cd),
            # m2 = mean(fd_rc) == 0; sum(fd_rc*cd) = sum(fd*cd) - corr_sum.
            loss_mean = (prod_sum - corr_sum) / T + (old_mean - shift) * cd_mean
        else:
            loss_mean = prod_sum / T - shift * cd_mean
        return loss_mean, cd_mean

    pos_loss, pos_cd = finish(s[0], s[1], s[2], s[3], pos_intra_shift)
    neg_loss, neg_cd = finish(s[4], s[5], s[6], s[7], neg_inter_shift)
    return pos_loss, pos_cd, neg_loss, neg_cd


# ---------------------- pure-JAX reference (for check) -------------------- #

def _reference(orig_feats, cluster_probs, perm_neg,
               pos_intra_shift, neg_inter_shift, pointwise=True):
    def nrm(t):
        n = jnp.sqrt(jnp.sum(t * t, axis=1, keepdims=True))
        return t / jnp.maximum(n, 1e-10)

    def corr(a, b):
        return jnp.einsum('nchw,ncij->nhwij', a, b)

    def helper(f1, f2, c1, c2, shift):
        fd = corr(nrm(f1), nrm(f2))
        if pointwise:
            old_mean = fd.mean()
            fd = fd - fd.mean(axis=(3, 4), keepdims=True)
            fd = fd - fd.mean() + old_mean
        cd = 1.0 - corr(nrm(c1), nrm(c2))
        loss = (fd - shift) * cd
        return loss.mean(), cd.mean()

    feats_neg = orig_feats[perm_neg]
    probs_neg = cluster_probs[perm_neg]
    pl_, pc_ = helper(orig_feats, orig_feats, cluster_probs, cluster_probs,
                      pos_intra_shift)
    nl_, nc_ = helper(orig_feats, feats_neg, cluster_probs, probs_neg,
                      neg_inter_shift)
    return pl_, pc_, nl_, nc_


# ---------------------------------- main ----------------------------------- #

if __name__ == "__main__":
    # cfg (deterministic, in-script)
    POS_INTRA_SHIFT = 0.18
    NEG_INTER_SHIFT = 0.46
    POINTWISE = True

    key = jax.random.PRNGKey(0)
    k_f, k_c, k_p = jax.random.split(key, 3)

    N, C, K, H, W = 2, 8, 4, 16, 16
    orig_feats = jax.random.normal(k_f, (N, C, H, W), dtype=jnp.float32)
    cluster_probs = jax.nn.softmax(
        jax.random.normal(k_c, (N, K, H, W), dtype=jnp.float32), axis=1)

    # TODO(synk): torch.randperm RNG is not reproducible in JAX; we use a
    # deterministic jax.random permutation with the same fixed-point fix.
    perm_neg = super_perm(N, k_p)

    outs = contrastive_correlation_loss(orig_feats, cluster_probs, perm_neg,
                                        POS_INTRA_SHIFT, NEG_INTER_SHIFT,
                                        pointwise=POINTWISE)
    outs = jax.block_until_ready(outs)

    refs = _reference(orig_feats, cluster_probs, perm_neg,
                      POS_INTRA_SHIFT, NEG_INTER_SHIFT, pointwise=POINTWISE)
    refs = jax.block_until_ready(refs)

    for o, r in zip(outs, refs):
        assert jnp.allclose(o, r, rtol=1e-4, atol=1e-4), (o, r)

    print("KERNEL_OK")
</pallas_src>

<mosaic_0001>
module attributes {stable_mosaic.version = 11 : i64} {
  func.func @_ccl_kernel(%arg0: i32, %arg1: memref<2xi32, #tpu.memory_space<smem>>, %arg2: memref<1x8x256xf32, #tpu.memory_space<vmem>>, %arg3: memref<1x8x256xf32, #tpu.memory_space<vmem>>, %arg4: memref<1x4x256xf32, #tpu.memory_space<vmem>>, %arg5: memref<1x4x256xf32, #tpu.memory_space<vmem>>, %arg6: memref<1x8x256xf32, #tpu.memory_space<vmem>>) attributes {dimension_semantics = [#tpu.dimension_semantics<parallel>], iteration_bounds = array<i64: 2>, scalar_prefetch = 1 : i64, scratch_operands = 0 : i64, tpu.core_type = #tpu.core_type<tc>, window_params = [{transform_indices = @transform_0, window_bounds = array<i64: 1, 8, 256>}, {transform_indices = @transform_1, window_bounds = array<i64: 1, 8, 256>}, {transform_indices = @transform_2, window_bounds = array<i64: 1, 4, 256>}, {transform_indices = @transform_3, window_bounds = array<i64: 1, 4, 256>}, {transform_indices = @transform_4, window_bounds = array<i64: 1, 8, 256>}]} {
    %c0 = arith.constant 0 : index
    %c0_0 = arith.constant 0 : index
    %c0_1 = arith.constant 0 : index
    %0 = vector.load %arg2[%c0, %c0_0, %c0_1] : memref<1x8x256xf32, #tpu.memory_space<vmem>>, vector<1x8x256xf32>
    %1 = vector.shape_cast %0 : vector<1x8x256xf32> to vector<8x256xf32>
    %2 = arith.mulf %1, %1 : vector<8x256xf32>
    %cst = arith.constant dense<0.000000e+00> : vector<256xf32>
    %3 = vector.multi_reduction <add>, %2, %cst [0] : vector<8x256xf32> to vector<256xf32>
    %4 = vector.shape_cast %3 : vector<256xf32> to vector<1x256xf32>
    %cst_2 = arith.constant 9.99999968E-21 : f32
    %5 = vector.broadcast %cst_2 : f32 to vector<1x256xf32>
    %6 = arith.maximumf %4, %5 : vector<1x256xf32>
    %7 = math.rsqrt %6 : vector<1x256xf32>
    %8 = vector.broadcast %7 : vector<1x256xf32> to vector<8x256xf32>
    %9 = arith.mulf %1, %8 : vector<8x256xf32>
    %c0_3 = arith.constant 0 : index
    %c0_4 = arith.constant 0 : index
    %c0_5 = arith.constant 0 : index
    %10 = vector.load %arg3[%c0_3, %c0_4, %c0_5] : memref<1x8x256xf32, #tpu.memory_space<vmem>>, vector<1x8x256xf32>
    %11 = vector.shape_cast %10 : vector<1x8x256xf32> to vector<8x256xf32>
    %12 = arith.mulf %11, %11 : vector<8x256xf32>
    %cst_6 = arith.constant dense<0.000000e+00> : vector<256xf32>
    %13 = vector.multi_reduction <add>, %12, %cst_6 [0] : vector<8x256xf32> to vector<256xf32>
    %14 = vector.shape_cast %13 : vector<256xf32> to vector<1x256xf32>
    %cst_7 = arith.constant 9.99999968E-21 : f32
    %15 = vector.broadcast %cst_7 : f32 to vector<1x256xf32>
    %16 = arith.maximumf %14, %15 : vector<1x256xf32>
    %17 = math.rsqrt %16 : vector<1x256xf32>
    %18 = vector.broadcast %17 : vector<1x256xf32> to vector<8x256xf32>
    %19 = arith.mulf %11, %18 : vector<8x256xf32>
    %c0_8 = arith.constant 0 : index
    %c0_9 = arith.constant 0 : index
    %c0_10 = arith.constant 0 : index
    %20 = vector.load %arg4[%c0_8, %c0_9, %c0_10] : memref<1x4x256xf32, #tpu.memory_space<vmem>>, vector<1x4x256xf32>
    %21 = vector.shape_cast %20 : vector<1x4x256xf32> to vector<4x256xf32>
    %22 = arith.mulf %21, %21 : vector<4x256xf32>
    %cst_11 = arith.constant dense<0.000000e+00> : vector<256xf32>
    %23 = vector.multi_reduction <add>, %22, %cst_11 [0] : vector<4x256xf32> to vector<256xf32>
    %24 = vector.shape_cast %23 : vector<256xf32> to vector<1x256xf32>
    %cst_12 = arith.constant 9.99999968E-21 : f32
    %25 = vector.broadcast %cst_12 : f32 to vector<1x256xf32>
    %26 = arith.maximumf %24, %25 : vector<1x256xf32>
    %27 = math.rsqrt %26 : vector<1x256xf32>
    %28 = vector.broadcast %27 : vector<1x256xf32> to vector<4x256xf32>
    %29 = arith.mulf %21, %28 : vector<4x256xf32>
    %c0_13 = arith.constant 0 : index
    %c0_14 = arith.constant 0 : index
    %c0_15 = arith.constant 0 : index
    %30 = vector.load %arg5[%c0_13, %c0_14, %c0_15] : memref<1x4x256xf32, #tpu.memory_space<vmem>>, vector<1x4x256xf32>
    %31 = vector.shape_cast %30 : vector<1x4x256xf32> to vector<4x256xf32>
    %32 = arith.mulf %31, %31 : vector<4x256xf32>
    %cst_16 = arith.constant dense<0.000000e+00> : vector<256xf32>
    %33 = vector.multi_reduction <add>, %32, %cst_16 [0] : vector<4x256xf32> to vector<256xf32>
    %34 = vector.shape_cast %33 : vector<256xf32> to vector<1x256xf32>
    %cst_17 = arith.constant 9.99999968E-21 : f32
    %35 = vector.broadcast %cst_17 : f32 to vector<1x256xf32>
    %36 = arith.maximumf %34, %35 : vector<1x256xf32>
    %37 = math.rsqrt %36 : vector<1x256xf32>
    %38 = vector.broadcast %37 : vector<1x256xf32> to vector<4x256xf32>
    %39 = arith.mulf %31, %38 : vector<4x256xf32>
    %cst_18 = arith.constant dense<0.000000e+00> : vector<8xf32>
    %40 = vector.multi_reduction <add>, %9, %cst_18 [1] : vector<8x256xf32> to vector<8xf32>
    %41 = vector.shape_cast %40 : vector<8xf32> to vector<8x1xf32>
    %cst_19 = arith.constant dense<0.000000e+00> : vector<8xf32>
    %42 = vector.multi_reduction <add>, %19, %cst_19 [1] : vector<8x256xf32> to vector<8xf32>
    %43 = vector.shape_cast %42 : vector<8xf32> to vector<8x1xf32>
    %cst_20 = arith.constant dense<0.000000e+00> : vector<4xf32>
    %44 = vector.multi_reduction <add>, %29, %cst_20 [1] : vector<4x256xf32> to vector<4xf32>
    %45 = vector.shape_cast %44 : vector<4xf32> to vector<4x1xf32>
    %cst_21 = arith.constant dense<0.000000e+00> : vector<4xf32>
    %46 = vector.multi_reduction <add>, %39, %cst_21 [1] : vector<4x256xf32> to vector<4xf32>
    %47 = vector.shape_cast %46 : vector<4xf32> to vector<4x1xf32>
    "tpu.trace_start"() <{level = 10 : i32, message = "cp,kp->ck"}> : () -> ()
    %cst_22 = arith.constant dense<0.000000e+00> : vector<8x4xf32>
    %48 = tpu.matmul %9, %29, %cst_22 {dimension_numbers = #tpu.dot_dimension_numbers<[1], [1], [0], [0], [0, 0, 1, 0], [], []>} : vector<8x256xf32>, vector<4x256xf32>, vector<8x4xf32> -> vector<8x4xf32>
    "tpu.trace_stop"() : () -> ()
    "tpu.trace_start"() <{level = 10 : i32, message = "ck,kq->cq"}> : () -> ()
    %cst_23 = arith.constant dense<0.000000e+00> : vector<8x256xf32>
    %49 = tpu.matmul %48, %29, %cst_23 {dimension_numbers = #tpu.dot_dimension_numbers<[1], [0], [0], [1], [0, 0, 1, 1], [], []>} : vector<8x4xf32>, vector<4x256xf32>, vector<8x256xf32> -> vector<8x256xf32>
    "tpu.trace_stop"() : () -> ()
    %50 = vector.broadcast %41 : vector<8x1xf32> to vector<8x256xf32>
    %51 = arith.subf %50, %49 : vector<8x256xf32>
    %52 = arith.mulf %9, %51 : vector<8x256xf32>
    %cst_24 = arith.constant dense<0.000000e+00> : vector<256xf32>
    %53 = vector.multi_reduction <add>, %52, %cst_24 [0] : vector<8x256xf32> to vector<256xf32>
    %54 = vector.shape_cast %53 : vector<256xf32> to vector<1x256xf32>
    %55 = vector.broadcast %45 : vector<4x1xf32> to vector<4x256xf32>
    %56 = arith.mulf %29, %55 : vector<4x256xf32>
    %cst_25 = arith.constant dense<0.000000e+00> : vector<256xf32>
    %57 = vector.multi_reduction <add>, %56, %cst_25 [0] : vector<4x256xf32> to vector<256xf32>
    %58 = vector.shape_cast %57 : vector<256xf32> to vector<1x256xf32>
    %cst_26 = arith.constant 2.560000e+02 : f32
    %59 = vector.broadcast %cst_26 : f32 to vector<1x256xf32>
    %60 = arith.subf %59, %58 : vector<1x256xf32>
    %61 = vector.broadcast %41 : vector<8x1xf32> to vector<8x256xf32>
    %62 = arith.mulf %9, %61 : vector<8x256xf32>
    %cst_27 = arith.constant dense<0.000000e+00> : vector<256xf32>
    %63 = vector.multi_reduction <add>, %62, %cst_27 [0] : vector<8x256xf32> to vector<256xf32>
    %64 = vector.shape_cast %63 : vector<256xf32> to vector<1x256xf32>
    %cst_28 = arith.constant 3.906250e-03 : f32
    %65 = vector.broadcast %cst_28 : f32 to vector<1x256xf32>
    %66 = arith.mulf %65, %64 : vector<1x256xf32>
    %67 = arith.mulf %66, %60 : vector<1x256xf32>
    "tpu.trace_start"() <{level = 10 : i32, message = "ck,kq->cq"}> : () -> ()
    %cst_29 = arith.constant dense<0.000000e+00> : vector<8x256xf32>
    %68 = tpu.matmul %48, %39, %cst_29 {dimension_numbers = #tpu.dot_dimension_numbers<[1], [0], [0], [1], [0, 0, 1, 1], [], []>} : vector<8x4xf32>, vector<4x256xf32>, vector<8x256xf32> -> vector<8x256xf32>
    "tpu.trace_stop"() : () -> ()
    %69 = vector.broadcast %41 : vector<8x1xf32> to vector<8x256xf32>
    %70 = arith.subf %69, %68 : vector<8x256xf32>
    %71 = arith.mulf %19, %70 : vector<8x256xf32>
    %cst_30 = arith.constant dense<0.000000e+00> : vector<256xf32>
    %72 = vector.multi_reduction <add>, %71, %cst_30 [0] : vector<8x256xf32> to vector<256xf32>
    %73 = vector.shape_cast %72 : vector<256xf32> to vector<1x256xf32>
    %74 = vector.broadcast %47 : vector<4x1xf32> to vector<4x256xf32>
    %75 = arith.mulf %29, %74 : vector<4x256xf32>
    %cst_31 = arith.constant dense<0.000000e+00> : vector<256xf32>
    %76 = vector.multi_reduction <add>, %75, %cst_31 [0] : vector<4x256xf32> to vector<256xf32>
    %77 = vector.shape_cast %76 : vector<256xf32> to vector<1x256xf32>
    %cst_32 = arith.constant 2.560000e+02 : f32
    %78 = vector.broadcast %cst_32 : f32 to vector<1x256xf32>
    %79 = arith.subf %78, %77 : vector<1x256xf32>
    %80 = vector.broadcast %43 : vector<8x1xf32> to vector<8x256xf32>
    %81 = arith.mulf %9, %80 : vector<8x256xf32>
    %cst_33 = arith.constant dense<0.000000e+00> : vector<256xf32>
    %82 = vector.multi_reduction <add>, %81, %cst_33 [0] : vector<8x256xf32> to vector<256xf32>
    %83 = vector.shape_cast %82 : vector<256xf32> to vector<1x256xf32>
    %cst_34 = arith.constant 3.906250e-03 : f32
    %84 = vector.broadcast %cst_34 : f32 to vector<1x256xf32>
    %85 = arith.mulf %84, %83 : vector<1x256xf32>
    %86 = arith.mulf %85, %79 : vector<1x256xf32>
    %87 = tpu.concatenate %54, %66, %60, %67, %73, %85, %79, %86 in 0 : vector<1x256xf32>, vector<1x256xf32>, vector<1x256xf32>, vector<1x256xf32>, vector<1x256xf32>, vector<1x256xf32>, vector<1x256xf32>, vector<1x256xf32> -> vector<8x256xf32>
    %c0_35 = arith.constant 0 : index
    %c0_36 = arith.constant 0 : index
    %c0_37 = arith.constant 0 : index
    %88 = vector.load %arg6[%c0_35, %c0_36, %c0_37] : memref<1x8x256xf32, #tpu.memory_space<vmem>>, vector<1x8x256xf32>
    %89 = vector.shape_cast %88 : vector<1x8x256xf32> to vector<8x256xf32>
    %90 = vector.shape_cast %87 : vector<8x256xf32> to vector<1x8x256xf32>
    tpu.vector_store %arg6[%c0_35, %c0_36, %c0_37], %90 {strides = array<i32>} : memref<1x8x256xf32, #tpu.memory_space<vmem>>, vector<1x8x256xf32>,
    return
  }
  func.func @transform_0(%arg0: i32, %arg1: memref<2xi32, #tpu.memory_space<smem>>) -> (i32, i32, i32) {
    %c0_i32 = arith.constant 0 : i32
    %c0_i32_0 = arith.constant 0 : i32
    %c0_i32_1 = arith.constant 0 : i32
    return %arg0, %c0_i32, %c0_i32_0 : i32, i32, i32
  }
  func.func @transform_1(%arg0: i32, %arg1: memref<2xi32, #tpu.memory_space<smem>>) -> (i32, i32, i32) {
    %0 = arith.index_cast %arg0 : i32 to index
    %1 = memref.load %arg1[%0] : memref<2xi32, #tpu.memory_space<smem>>
    %c0_i32 = arith.constant 0 : i32
    %c0_i32_0 = arith.constant 0 : i32
    %c0_i32_1 = arith.constant 0 : i32
    return %1, %c0_i32, %c0_i32_0 : i32, i32, i32
  }
  func.func @transform_2(%arg0: i32, %arg1: memref<2xi32, #tpu.memory_space<smem>>) -> (i32, i32, i32) {
    %c0_i32 = arith.constant 0 : i32
    %c0_i32_0 = arith.constant 0 : i32
    %c0_i32_1 = arith.constant 0 : i32
    return %arg0, %c0_i32, %c0_i32_0 : i32, i32, i32
  }
  func.func @transform_3(%arg0: i32, %arg1: memref<2xi32, #tpu.memory_space<smem>>) -> (i32, i32, i32) {
    %0 = arith.index_cast %arg0 : i32 to index
    %1 = memref.load %arg1[%0] : memref<2xi32, #tpu.memory_space<smem>>
    %c0_i32 = arith.constant 0 : i32
    %c0_i32_0 = arith.constant 0 : i32
    %c0_i32_1 = arith.constant 0 : i32
    return %1, %c0_i32, %c0_i32_0 : i32, i32, i32
  }
  func.func @transform_4(%arg0: i32, %arg1: memref<2xi32, #tpu.memory_space<smem>>) -> (i32, i32, i32) {
    %c0_i32 = arith.constant 0 : i32
    %c0_i32_0 = arith.constant 0 : i32
    %c0_i32_1 = arith.constant 0 : i32
    return %arg0, %c0_i32, %c0_i32_0 : i32, i32, i32
  }
}

</mosaic_0001>

<bundles_post_ra>
// kernel: contrastive_correlation_loss.1
= control target key start
LH: loop header
LB: loop body
LE: loop exit
PB: predicated region body
PF: predicated region fallthrough
CT: control target
= control target key end

     0   :  { %s950_s21 = smov [#allocation3]   ;;  %s1131_s0 = inlined_call_operand.vmem [shape: s32[2], index: 0, kind: input, shape index: {}]   ;;  %s1132_s1 = inlined_call_operand.vmem [shape: f32[2,8,256], index: 1, kind: input, shape index: {}, may-alias: {1,2}]   ;;  %s1133_s2 = inlined_call_operand.vmem [shape: f32[2,8,256], index: 2, kind: input, shape index: {}, may-alias: {1,2}]   ;;  %s1134_s3 = inlined_call_operand.vmem [shape: f32[2,4,256], index: 3, kind: input, shape index: {}, may-alias: {3,4}]   ;;  %s1135_s4 = inlined_call_operand.vmem [shape: f32[2,4,256], index: 4, kind: input, shape index: {}, may-alias: {3,4}]   ;;  %s1136_s5 = inlined_call_operand.vmem [shape: f32[2,8,256], index: 5, kind: output, shape index: {}]  }
   0x1   :  { %s11_s20 = sshll.u32 %s1131_s0, 4  ;;  %s12_s20 = int_to_ptr.vmem [resolvable:$true] %s11_s20 }
   0x2   :  { %14 = dma.vmem_to_smem %s12_s20, 16, %s950_s21, [#allocation2] }
   0x3   :  { %944 = dma.done.wait [#allocation2], 16 }
   0x4   :  { %945 = vsyncadd [#allocation2], 4294967280 }
   0x5   :  { %17 = sfence }
   0x6   :  { %s985_s22 = smov 0  }
   0x7 LB: > { %s991_s23 = sadd.s32 4294967295, %s948_s22   ;;  %p876_p0 = scmp.ge.s32.totalorder %s948_s22, 1  ;;  %s948_s22 = sphi %s985_s22, %s23_s22  }
   0x8   : > { %p209_p1 = scmp.lt.s32.totalorder %s948_s22, 3 }
   0xa   : > { %p210_p2 = pnand %p876_p0, %p209_p1 }
   0xb   : > { %p252_p3 = scmp.lt.s32.totalorder (!%p210_p2), %s991_s23, 1  ;;  %s269_s0 = sld [smem:[#allocation3 + %s991_s23]] (!%p210_p2) }
   0xc   : > { %213 = sbr.rel (%p210_p2) target bundleno = 388 (0x184), region = 36  ;;  %s257_s12 = sld [smem:[#allocation3 + %s991_s23]] (!%p210_p2) }
  0x11   : > { %s998_s24 = scalar_select %p252_p3, %s991_s23, 1  ;;  %vm369_vm0 = vcmask 1043456  }
  0x12   : > { %p270_p4 = scmp.lt.s32.totalorder %s269_s0, 1  ;;  %p258_p5 = scmp.lt.s32.totalorder %s257_s12, 1 }
  0x13   : > { %s899_s25 = sshll.u32 %s998_s24, 3  ;;  %s897_s29 = sshll.u32 %s998_s24, 4 }
  0x14   : > { %s268_s28 = scalar_lea.vmem %s1134_s3, %s899_s25  ;;  %s1144_s0 = smov (!%p270_p4, %s269_s0), 1 }
  0x15   : > { %v1004_v0 = vld [vmem:[%s268_s28] sm:$0xff]  ;;  %s900_s30 = sshll.u32 %s1144_s0, 3  ;;  %s256_s11 = scalar_lea.vmem %s1132_s1, %s897_s29 }
  0x16   : > { %v362_v1 = vmul.f32 %v1004_v0, %v1004_v0  ;;  %s274_s8 = scalar_lea.vmem %s1135_s4, %s900_s30  ;;  %v1021_v4 = vld [vmem:[%s256_s11] sm:$0xff]  ;;  %v1023_v5 = vld [vmem:[%s256_s11 + $0x8] sm:$0xff]  ;;  %s1146_s12 = smov (!%p258_p5, %s257_s12), 1 }
  0x17   : > { %v1017_v2 = vld [vmem:[%s274_s8] sm:$0xff]  ;;  %v283_v6 = vmul.f32 %v1021_v4, %v1021_v4  ;;  %v284_v7 = vmul.f32 %v1023_v5, %v1023_v5  ;;  %s898_s13 = sshll.u32 %s1146_s12, 4  ;;  %s280_s19 = scalar_lea.vmem %s1136_s5, %s897_s29 }
  0x18   : > { %364 = vst [vmem:[#allocation1] ss:$2 sm:$0xff] %v362_v1  ;;  %v413_v3 = vmul.f32 %v1017_v2, %v1017_v2  ;;  %s262_s16 = scalar_lea.vmem %s1133_s2, %s898_s13 }
  0x19   : > { %v285_v12 = vrot.slane %v283_v6, 4  ;;  %v291_v13 = vrot.slane %v284_v7, 4 }
  0x1b   : > { %v286_v16 = vadd.f32 %v285_v12, %v283_v6  ;;  %v292_v17 = vadd.f32 %v291_v13, %v284_v7 }
  0x1d   : > { %v287_v20 = vrot.slane %v286_v16, 2  ;;  %v293_v21 = vrot.slane %v292_v17, 2 }
  0x1f   : > { %v365_v8 = vld.sshfl [vmem:[#allocation1] sm:$0xff pattern:$0x75316420]  ;;  %v366_v9 = vld.sshfl [vmem:[#allocation1 + $0x8] sm:$0xff pattern:$0x75316420]  ;;  %v288_v24 = vadd.f32 %v287_v20, %v286_v16  ;;  %v294_v25 = vadd.f32 %v293_v21, %v292_v17 }
  0x20   : > { %v370_v10 = vsel %vm369_vm0, %v365_v8, 0.0  ;;  %v377_v11 = vsel %vm369_vm0, %v366_v9, 0.0  ;;  %415 = vst [vmem:[#allocation1] ss:$2 sm:$0xff] %v413_v3 }
  0x21   : > { %v371_v14 = vrot.slane %v370_v10, 4  ;;  %v378_v15 = vrot.slane %v377_v11, 4  ;;  %v289_v32 = vrot.slane %v288_v24, 1  ;;  %v295_v33 = vrot.slane %v294_v25, 1 }
  0x23   : > { %v372_v18 = vadd.f32 %v371_v14, %v370_v10  ;;  %v379_v19 = vadd.f32 %v378_v15, %v377_v11  ;;  %v290_v38 = vadd.f32 %v289_v32, %v288_v24  ;;  %v296_v39 = vadd.f32 %v295_v33, %v294_v25 }
  0x25   : > { %v373_v22 = vrot.slane %v372_v18, 2  ;;  %v380_v23 = vrot.slane %v379_v19, 2  ;;  %v297_v44 = vmax.f32 %v290_v38, 1e-20  ;;  %v1033_v45 = vmax.f32 %v296_v39, 1e-20 }
  0x27   : > { %v374_v26 = vadd.f32 %v373_v22, %v372_v18  ;;  %v381_v27 = vadd.f32 %v380_v23, %v379_v19  ;;  %v416_v28 = vld.sshfl [vmem:[#allocation1] sm:$0xff pattern:$0x75316420]  ;;  %v417_v29 = vld.sshfl [vmem:[#allocation1 + $0x8] sm:$0xff pattern:$0x75316420]  ;;  %912 = vrsqrt.f32 %v297_v44  ;;  %vm305_vm7 = vweird.f32 %v297_v44 }
  0x28   : > { %v420_v30 = vsel %vm369_vm0, %v416_v28, 0.0  ;;  %v427_v31 = vsel %vm369_vm0, %v417_v29, 0.0  ;;  %vm315_vm10 = vweird.f32 %v1033_v45 }
  0x29   : > { %v375_v34 = vrot.slane %v374_v26, 1  ;;  %v382_v35 = vrot.slane %v381_v27, 1  ;;  %v421_v36 = vrot.slane %v420_v30, 4  ;;  %v428_v37 = vrot.slane %v427_v31, 4 }
  0x2b   : > { %v376_v40 = vadd.f32 %v375_v34, %v374_v26  ;;  %v383_v41 = vadd.f32 %v382_v35, %v381_v27  ;;  %v422_v42 = vadd.f32 %v421_v36, %v420_v30  ;;  %v429_v43 = vadd.f32 %v428_v37, %v427_v31 }
  0x2d   : > { %v384_v46 = vmax.f32 %v376_v40, 1e-20  ;;  %v385_v47 = vmax.f32 %v383_v41, 1e-20  ;;  %v423_v48 = vrot.slane %v422_v42, 2  ;;  %v430_v49 = vrot.slane %v429_v43, 2  ;;  %v913_v55 = vpop.eup %912 }
  0x2e   : > { %v300_v59 = vmul.f32 %v913_v55, %v297_v44  ;;  %vm306_vm8 = vweird.f32 %v913_v55 }
  0x2f   : > { %914 = vrsqrt.f32 %v384_v46  ;;  %v424_v50 = vadd.f32 %v423_v48, %v422_v42  ;;  %v431_v51 = vadd.f32 %v430_v49, %v429_v43  ;;  %vm392_vm1 = vweird.f32 %v384_v46  ;;  %vm1045_vm9 = vmor %vm305_vm7, %vm306_vm8 }
  0x30   : > { %916 = vrsqrt.f32 %v385_v47  ;;  %v301_v6 = vmul.f32 %v913_v55, %v300_v59  ;;  %vm402_vm3 = vweird.f32 %v385_v47 }
  0x31   : > { %v425_v52 = vrot.slane %v424_v50, 1  ;;  %918 = vrsqrt.f32 %v1033_v45  ;;  %v432_v53 = vrot.slane %v431_v51, 1 }
  0x32   : > { %v302_v10 = vmul.f32 0.5, %v301_v6 }
  0x33   : > { %v426_v54 = vadd.f32 %v425_v52, %v424_v50  ;;  %v433_v56 = vadd.f32 %v432_v53, %v431_v51 }
  0x34   : > { %v303_v15 = vsub.f32 1.5, %v302_v10 }
  0x35   : > { %v915_v57 = vpop.eup %914  ;;  %v434_v58 = vmax.f32 %v426_v54, 1e-20  ;;  %v435_v62 = vmax.f32 %v433_v56, 1e-20 }
  0x36   : > { %v917_v60 = vpop.eup %916  ;;  %v387_v61 = vmul.f32 %v915_v57, %v384_v46  ;;  %vm393_vm2 = vweird.f32 %v915_v57  ;;  %v304_v23 = vmul.f32 %v913_v55, %v303_v15 }
  0x37   : > { %v919_v63 = vpop.eup %918  ;;  %v397_v1 = vmul.f32 %v917_v60, %v385_v47  ;;  %920 = vrsqrt.f32 %v434_v58  ;;  %vm403_vm4 = vweird.f32 %v917_v60  ;;  %vm1037_vm5 = vmor %vm392_vm1, %vm393_vm2  ;;  %vm442_vm12 = vweird.f32 %v434_v58 }
  0x38   : > { %v388_v3 = vmul.f32 %v915_v57, %v387_v61  ;;  %922 = vrsqrt.f32 %v435_v62  ;;  %v310_v8 = vmul.f32 %v919_v63, %v1033_v45  ;;  %vm1041_vm6 = vmor %vm402_vm3, %vm403_vm4  ;;  %v308_v30 = vsel %vm1045_vm9, %v913_v55, %v304_v23 }
  0x39   : > { %v398_v7 = vmul.f32 %v917_v60, %v397_v1  ;;  %vm316_vm11 = vweird.f32 %v919_v63  ;;  %vm452_vm15 = vweird.f32 %v435_v62  ;;  %v1058_v40 = vmul.f32 %v308_v30, %v1021_v4 }
  0x3a   : > { %v389_v9 = vmul.f32 0.5, %v388_v3  ;;  %v311_v12 = vmul.f32 %v919_v63, %v310_v8  ;;  %vm317_vm14 = vmor %vm315_vm10, %vm316_vm11  ;;  %vm538_vm10 = vcmask 31744   ;;  %vm759_vm11 = vcmask 1040384  }
  0x3b   : > { %v399_v11 = vmul.f32 0.5, %v398_v7 }
  0x3c   : > { %v390_v13 = vsub.f32 1.5, %v389_v9  ;;  %v312_v19 = vmul.f32 0.5, %v311_v12 }
  0x3d   : > { %v921_v16 = vpop.eup %920  ;;  %v400_v17 = vsub.f32 1.5, %v399_v11 }
  0x3e   : > { %v923_v20 = vpop.eup %922  ;;  %v391_v21 = vmul.f32 %v915_v57, %v390_v13  ;;  %v437_v22 = vmul.f32 %v921_v16, %v434_v58  ;;  %v313_v27 = vsub.f32 1.5, %v312_v19  ;;  %vm443_vm13 = vweird.f32 %v921_v16  ;;  %v322_v58 = vld [vmem:[%s262_s16 + $0x8] sm:$0xff] }
  0x3f   : > { %v401_v25 = vmul.f32 %v917_v60, %v400_v17  ;;  %v447_v26 = vmul.f32 %v923_v20, %v435_v62  ;;  %vm453_vm1 = vweird.f32 %v923_v20  ;;  %vm444_vm2 = vmor %vm442_vm12, %vm443_vm13  ;;  %v951_v17 = vmov 839922192  }
  0x40   : > { %v395_v28 = vsel %vm1037_vm5, %v915_v57, %v391_v21  ;;  %v438_v29 = vmul.f32 %v921_v16, %v437_v22  ;;  %v314_v33 = vmul.f32 %v919_v63, %v313_v27  ;;  %vm454_vm3 = vmor %vm452_vm15, %vm453_vm1  ;;  %v604_v18 = vunpack.c.l.s4 %v951_v17 }
  0x41   : > { %v405_v31 = vsel %vm1041_vm6, %v917_v60, %v401_v25  ;;  %v448_v32 = vmul.f32 %v923_v20, %v447_v26  ;;  %v324_v60 = vmul.f32 %v322_v58, %v322_v58  ;;  %vm762_vm12 = vcmask 1041408  }
  0x42   : > { %v408_v34 = vrot.slane %v405_v31, 4  ;;  %v439_v35 = vmul.f32 0.5, %v438_v29  ;;  %v318_v37 = vsel %vm317_vm14, %v919_v63, %v314_v33  ;;  %v605_v19 = vunpack.c.0.s8 %v604_v18 }
  0x43   : > { %v449_v36 = vmul.f32 0.5, %v448_v32  ;;  %v1061_v41 = vmul.f32 %v318_v37, %v1023_v5  ;;  %v331_v62 = vrot.slane %v324_v60, 4  ;;  %vm765_vm13 = vcmask 1042432  }
  0x44   : > { %v409_v38 = vsel %vm369_vm0, %v395_v28, %v408_v34  ;;  %v440_v39 = vsub.f32 1.5, %v439_v35  ;;  %vm770_vm14 = vcmask 1044480   ;;  %vm773_vm15 = vcmask 1045504  }
  0x45   : > { %v1064_v42 = vmul.f32 %v409_v38, %v1004_v0  ;;  %v450_v43 = vsub.f32 1.5, %v449_v36  ;;  %v462_v45 = vadd.f32 %v1061_v41, %v1058_v40  ;;  %v332_v6 = vadd.f32 %v331_v62, %v324_v60 }
  0x46   : > { %v441_v44 = vmul.f32 %v921_v16, %v440_v39  ;;  %vm776_vm1 = vcmask 1046528  }
  0x47   : > { %v451_v46 = vmul.f32 %v923_v20, %v450_v43  ;;  %469 = vst [vmem:[#allocation1] ss:$2 sm:$0xff] %v1064_v42  ;;  %463 = vadd.xlane.f32.xlu1 %v462_v45  ;;  %v333_v8 = vrot.slane %v332_v6, 2 }
  0x48   : > { %v445_v47 = vsel %vm444_vm2, %v921_v16, %v441_v44 }
  0x49   : > { %v455_v4 = vsel %vm454_vm3, %v923_v20, %v451_v46  ;;  %v334_v10 = vadd.f32 %v333_v8, %v332_v6 }
  0x4a   : > { %v458_v48 = vrot.slane %v455_v4, 4 }
  0x4b   : > { %v335_v12 = vrot.slane %v334_v10, 1 }
  0x4c   : > { %v459_v5 = vsel %vm369_vm0, %v445_v47, %v458_v48 }
  0x4d   : > { %v1071_v49 = vmul.f32 %v459_v5, %v1017_v2  ;;  %v321_v2 = vld [vmem:[%s262_s16] sm:$0xff]  ;;  %v336_v14 = vadd.f32 %v335_v12, %v334_v10 }
  0x4e   : > { %v470_v0 = vld.sshfl [vmem:[#allocation1] sm:$0xff pattern:$0x75316420]  ;;  %v471_v50 = vld.sshfl [vmem:[#allocation1 + $0x8] sm:$0xff pattern:$0x75316420]  ;;  %v323_v59 = vmul.f32 %v321_v2, %v321_v2 }
  0x4f   : > { %v474_v51 = vsel %vm369_vm0, %v470_v0, 0.0  ;;  %v475_v52 = vsel %vm369_vm0, %v471_v50, 0.0  ;;  %480 = vst [vmem:[#allocation1] ss:$2 sm:$0xff] %v1071_v49  ;;  %v338_v16 = vmax.f32 %v336_v14, 1e-20 }
  0x50   : > { %v476_v53 = vadd.f32 %v475_v52, %v474_v51  ;;  %v325_v61 = vrot.slane %v323_v59, 4 }
  0x51   : > { %vm355_vm6 = vweird.f32 %v338_v16 }
  0x52   : > { %477 = vadd.xlane.f32.xlu0 %v476_v53  ;;  %v326_v3 = vadd.f32 %v325_v61, %v323_v59 }
  0x54   : > { %v327_v7 = vrot.slane %v326_v3, 2 }
  0x56   : > { %v481_v54 = vld.sshfl [vmem:[#allocation1] sm:$0xff pattern:$0x75316420]  ;;  %v482_v55 = vld.sshfl [vmem:[#allocation1 + $0x8] sm:$0xff pattern:$0x75316420]  ;;  %v328_v9 = vadd.f32 %v327_v7, %v326_v3 }
  0x57   : > { %490 = vst [vmem:[#allocation1] ss:$2 sm:$0xff] %v1064_v42  ;;  %v485_v20 = vsel %vm369_vm0, %v481_v54, 0.0  ;;  %v486_v21 = vsel %vm369_vm0, %v482_v55, 0.0 }
  0x58   : > { %v329_v11 = vrot.slane %v328_v9, 1  ;;  %v487_v22 = vadd.f32 %v486_v21, %v485_v20 }
  0x5a   : > { %v330_v13 = vadd.f32 %v329_v11, %v328_v9  ;;  %488 = vadd.xlane.f32.xlu0 %v487_v22 }
  0x5c   : > { %v337_v15 = vmax.f32 %v330_v13, 1e-20 }
  0x5e   : > { %v491_v56 = vld.sshfl [vmem:[#allocation1] sm:$0xff pattern:$0x75316420]  ;;  %v492_v57 = vld.sshfl [vmem:[#allocation1 + $0x8] sm:$0xff pattern:$0x75316420]  ;;  %924 = vrsqrt.f32 %v337_v15  ;;  %vm345_vm4 = vweird.f32 %v337_v15 }
  0x5f   : > { %510 = vmatpush.xpose.msra.mxu0 %v491_v56  ;;  %530 = vmatpush.xpose.msra.mxu1 %v492_v57  ;;  %535 = vst [vmem:[#allocation1] ss:$2 sm:$0xff] %v1064_v42  ;;  %926 = vrsqrt.f32 %v338_v16 }
  0x62   : > { %511 = vmatmul.f32.vlgmr.msra.gmra.mxu0 %v1058_v40  ;;  %531 = vmatmul.f32.vlgmr.msra.gmra.mxu1 %v1061_v41 }
  0x64   : > { %v925_v23 = vpop.eup %924 }
  0x65   : > { %v927_v25 = vpop.eup %926  ;;  %v340_v27 = vmul.f32 %v925_v23, %v337_v15  ;;  %vm346_vm5 = vweird.f32 %v925_v23 }
  0x66   : > { %v536_v63 = vld.sshfl [vmem:[#allocation1] sm:$0xff pattern:$0x75316420]  ;;  %v537_v1 = vld.sshfl [vmem:[#allocation1 + $0x8] sm:$0xff pattern:$0x75316420]  ;;  %v350_v28 = vmul.f32 %v927_v25, %v338_v16  ;;  %vm356_vm7 = vweird.f32 %v927_v25  ;;  %vm347_vm8 = vmor %vm345_vm4, %vm346_vm5 }
  0x67   : > { %887 = vmatpush.msk.msra.mxu2 %vm369_vm0, %v536_v63  ;;  %889 = vmatpush.msk.msra.mxu3 %vm369_vm0, %v537_v1  ;;  %v341_v30 = vmul.f32 %v925_v23, %v340_v27  ;;  %vm357_vm9 = vmor %vm355_vm6, %vm356_vm7 }
  0x68   : > { %v351_v31 = vmul.f32 %v927_v25, %v350_v28 }
  0x69   : > { %v342_v32 = vmul.f32 0.5, %v341_v30 }
  0x6a   : > { %v352_v33 = vmul.f32 0.5, %v351_v31 }
  0x6b   : > { %v343_v34 = vsub.f32 1.5, %v342_v32 }
  0x6c   : > { %v353_v35 = vsub.f32 1.5, %v352_v33 }
  0x6d   : > { %v344_v36 = vmul.f32 %v925_v23, %v343_v34 }
  0x6e   : > { %v354_v37 = vmul.f32 %v927_v25, %v353_v35 }
  0x6f   : > { %v348_v38 = vsel %vm347_vm8, %v925_v23, %v344_v36 }
  0x70   : > { %v358_v44 = vsel %vm357_vm9, %v927_v25, %v354_v37  ;;  %v1089_v45 = vmul.f32 %v348_v38, %v321_v2 }
  0x71   : > { %v1092_v46 = vmul.f32 %v358_v44, %v322_v58 }
  0x73   : > { %v465_v47 = vadd.f32 %v1092_v46, %v1089_v45 }
  0x75   : > { %466 = vadd.xlane.f32.xlu1 %v465_v47 }
  0xba   : > { %v1099_v53 = vpop.xlane.xlu1 %463 }
  0xbb   : > { %v631_v54 = vmul.f32 %v1099_v53, %v1058_v40  ;;  %v632_v55 = vmul.f32 %v1099_v53, %v1061_v41 }
  0xbd   : > { %v633_v56 = vrot.slane %v631_v54, 4  ;;  %v639_v57 = vrot.slane %v632_v55, 4 }
  0xbf   : > { %v634_v3 = vadd.f32 %v633_v56, %v631_v54  ;;  %v640_v6 = vadd.f32 %v639_v57, %v632_v55 }
  0xc1   : > { %v635_v13 = vrot.slane %v634_v3, 2  ;;  %v641_v14 = vrot.slane %v640_v6, 2 }
  0xc3   : > { %v636_v25 = vadd.f32 %v635_v13, %v634_v3 }
  0xc5   : > { %v478_v24 = vpop.xlane.xlu0 %477  ;;  %v637_v37 = vrot.slane %v636_v25, 1 }
  0xc6   : > { %v606_v26 = vperm.slane %v478_v24, %v605_v19 }
  0xc7   : > { %v638_v54 = vadd.f32 %v637_v37, %v636_v25 }
  0xc8   : > { %v608_v29 = vmul.f32 %v606_v26, %v1064_v42  ;;  %v642_v26 = vadd.f32 %v641_v14, %v640_v6 }
  0xca   : > { %610 = vst [vmem:[#allocation1] ss:$2 sm:$0xff] %v608_v29  ;;  %v643_v38 = vrot.slane %v642_v26, 1 }
  0xcc   : > { %v644_v55 = vadd.f32 %v643_v38, %v642_v26 }
  0xd1   : > { %v611_v39 = vld.sshfl [vmem:[#allocation1] sm:$0xff pattern:$0x75316420]  ;;  %v612_v43 = vld.sshfl [vmem:[#allocation1 + $0x8] sm:$0xff pattern:$0x75316420] }
  0xd2   : > { %649 = vst [vmem:[#allocation1] ss:$2 sm:$0xff] %v1071_v49  ;;  %v489_v49 = vpop.xlane.xlu0 %488  ;;  %v615_v2 = vsel %vm369_vm0, %v611_v39, 0.0  ;;  %v622_v58 = vsel %vm369_vm0, %v612_v43, 0.0 }
  0xd3   : > { %v716_v51 = vperm.slane %v489_v49, %v605_v19  ;;  %v616_v62 = vrot.slane %v615_v2, 4 }
  0xd5   : > { %v718_v52 = vmul.f32 %v716_v51, %v1064_v42  ;;  %v623_v42 = vrot.slane %v622_v58, 4  ;;  %v617_v9 = vadd.f32 %v616_v62, %v615_v2 }
  0xd7   : > { %v624_v10 = vadd.f32 %v623_v42, %v622_v58  ;;  %v618_v18 = vrot.slane %v617_v9, 2 }
  0xd9   : > { %v650_v4 = vld.sshfl [vmem:[#allocation1] sm:$0xff pattern:$0x75316420]  ;;  %v651_v48 = vld.sshfl [vmem:[#allocation1 + $0x8] sm:$0xff pattern:$0x75316420]  ;;  %v619_v31 = vadd.f32 %v618_v18, %v617_v9 }
  0xda   : > { %891 = vmatpush.msk.msrb.mxu2 %vm369_vm0, %v650_v4  ;;  %893 = vmatpush.msk.msrb.mxu3 %vm369_vm0, %v651_v48  ;;  %720 = vst [vmem:[#allocation1] ss:$2 sm:$0xff] %v718_v52  ;;  %v625_v20 = vrot.slane %v624_v10, 2 }
  0xdb   : > { %v620_v4 = vrot.slane %v619_v31, 1 }
  0xdc   : > { %v626_v32 = vadd.f32 %v625_v20, %v624_v10 }
  0xde   : > { %v627_v48 = vrot.slane %v626_v32, 1 }
  0xdf   : > { %v512_v5 = vpop.f32.mrf.mxu0  ;;  %v532_v0 = vpop.f32.mrf.mxu1 }
  0xe0   : > { %v533_v50 = vadd.f32 %v532_v0, %v512_v5  ;;  %v628_v62 = vadd.f32 %v627_v48, %v626_v32 }
  0xe1   : > { %v721_v59 = vld.sshfl [vmem:[#allocation1] sm:$0xff pattern:$0x75316420]  ;;  %v722_v60 = vld.sshfl [vmem:[#allocation1 + $0x8] sm:$0xff pattern:$0x75316420] }
  0xe2   : > { %888 = vmatmul.msk.f32.vlgmr.msra.gmra.mxu2 %vm538_vm10, %v533_v50  ;;  %890 = vmatmul.msk.f32.vlgmr.msra.gmra.mxu3 %vm538_vm10, %v533_v50  ;;  %v725_v63 = vsel %vm369_vm0, %v721_v59, 0.0  ;;  %v732_v1 = vsel %vm369_vm0, %v722_v60, 0.0 }
  0xe3   : > { %v726_v11 = vrot.slane %v725_v63, 4  ;;  %v733_v12 = vrot.slane %v732_v1, 4 }
  0xe5   : > { %v727_v21 = vadd.f32 %v726_v11, %v725_v63  ;;  %v734_v22 = vadd.f32 %v733_v12, %v732_v1 }
  0xe7   : > { %v728_v33 = vrot.slane %v727_v21, 2  ;;  %v735_v34 = vrot.slane %v734_v22, 2 }
  0xe8   : > { %v467_v61 = vpop.xlane.xlu1 %466 }
  0xe9   : > { %v741_v7 = vmul.f32 %v467_v61, %v1058_v40  ;;  %v742_v8 = vmul.f32 %v467_v61, %v1061_v41  ;;  %v729_v5 = vadd.f32 %v728_v33, %v727_v21  ;;  %v736_v0 = vadd.f32 %v735_v34, %v734_v22 }
  0xea   : > { %892 = vmatmul.msk.f32.vlgmr.msrb.gmra.mxu2 %vm538_vm10, %v533_v50  ;;  %894 = vmatmul.msk.f32.vlgmr.msrb.gmra.mxu3 %vm538_vm10, %v533_v50  ;;  %v621_v61 = vadd.f32 %v620_v4, %v619_v31 }
  0xeb   : > { %v743_v15 = vrot.slane %v741_v7, 4  ;;  %v749_v16 = vrot.slane %v742_v8, 4  ;;  %v730_v42 = vrot.slane %v729_v5, 1  ;;  %v737_v63 = vrot.slane %v736_v0, 1 }
  0xec   : > { %v629_v14 = vsub.f32 256.0, %v621_v61 }
  0xed   : > { %v744_v27 = vadd.f32 %v743_v15, %v741_v7  ;;  %v750_v28 = vadd.f32 %v749_v16, %v742_v8  ;;  %v645_v8 = vmul.f32 0.00390625, %v638_v54  ;;  %v646_v15 = vmul.f32 0.00390625, %v644_v55 }
  0xee   : > { %v738_v16 = vadd.f32 %v737_v63, %v736_v0 }
  0xef   : > { %v745_v39 = vrot.slane %v744_v27, 2  ;;  %v751_v43 = vrot.slane %v750_v28, 2  ;;  %v647_v25 = vmul.f32 %v645_v8, %v629_v14 }
  0xf0   : > { %v740_v32 = vsub.f32 256.0, %v738_v16 }
  0xf1   : > { %v746_v56 = vadd.f32 %v745_v39, %v744_v27  ;;  %v752_v57 = vadd.f32 %v751_v43, %v750_v28 }
  0xf3   : > { %v753_v9 = vrot.slane %v752_v57, 1 }
  0xf5   : > { %v754_v22 = vadd.f32 %v753_v9, %v752_v57 }
  0xf7   : > { %v756_v34 = vmul.f32 0.00390625, %v754_v22 }
 0x165   : > { %v563_v17 = vpop.f32.mrf.mxu2  ;;  %v583_v19 = vpop.f32.mrf.mxu3 }
 0x166   : > { %v586_v23 = vsub.f32 %v1099_v53, %v563_v17  ;;  %v587_v24 = vsub.f32 %v1099_v53, %v583_v19 }
 0x168   : > { %v588_v29 = vmul.f32 %v586_v23, %v1058_v40  ;;  %v589_v30 = vmul.f32 %v587_v24, %v1061_v41 }
 0x16a   : > { %v590_v35 = vrot.slane %v588_v29, 4  ;;  %v596_v36 = vrot.slane %v589_v30, 4 }
 0x16c   : > { %v591_v44 = vadd.f32 %v590_v35, %v588_v29  ;;  %v597_v47 = vadd.f32 %v596_v36, %v589_v30 }
 0x16d   : > { %v673_v50 = vpop.f32.mrf.mxu2  ;;  %v693_v40 = vpop.f32.mrf.mxu3 }
 0x16e   : > { %v592_v49 = vrot.slane %v591_v44, 2  ;;  %v598_v41 = vrot.slane %v597_v47, 2  ;;  %v696_v51 = vsub.f32 %v1099_v53, %v673_v50  ;;  %v697_v52 = vsub.f32 %v1099_v53, %v693_v40 }
 0x16f   : > { %v747_v53 = vrot.slane %v746_v56, 1 }
 0x170   : > { %v593_v2 = vadd.f32 %v592_v49, %v591_v44  ;;  %v599_v58 = vadd.f32 %v598_v41, %v597_v47  ;;  %v698_v59 = vmul.f32 %v696_v51, %v1089_v45  ;;  %v699_v60 = vmul.f32 %v697_v52, %v1092_v46 }
 0x171   : > { %v630_v45 = vsub.f32 256.0, %v628_v62  ;;  %v731_v46 = vadd.f32 %v730_v42, %v729_v5  ;;  %v748_v21 = vadd.f32 %v747_v53, %v746_v56  ;;  %v758_v47 = vmul.f32 %v756_v34, %v740_v32 }
 0x172   : > { %v594_v1 = vrot.slane %v593_v2, 1  ;;  %v600_v3 = vrot.slane %v599_v58, 1  ;;  %v700_v6 = vrot.slane %v698_v59, 4  ;;  %v706_v7 = vrot.slane %v699_v60, 4 }
 0x173   : > { %v648_v26 = vmul.f32 %v646_v15, %v630_v45  ;;  %v739_v31 = vsub.f32 256.0, %v731_v46  ;;  %v755_v33 = vmul.f32 0.00390625, %v748_v21 }
 0x174   : > { %v595_v10 = vadd.f32 %v594_v1, %v593_v2  ;;  %v601_v11 = vadd.f32 %v600_v3, %v599_v58  ;;  %v701_v12 = vadd.f32 %v700_v6, %v698_v59  ;;  %v707_v13 = vadd.f32 %v706_v7, %v699_v60 }
 0x175   : > { %v757_v44 = vmul.f32 %v755_v33, %v739_v31 }
 0x176   : > { %v702_v17 = vrot.slane %v701_v12, 2  ;;  %v708_v18 = vrot.slane %v707_v13, 2  ;;  %v760_v19 = vsel %vm759_vm11, %v595_v10, %v645_v8  ;;  %v761_v20 = vsel %vm759_vm11, %v601_v11, %v646_v15 }
 0x177   : > { %v763_v27 = vsel %vm762_vm12, %v760_v19, %v629_v14  ;;  %v764_v28 = vsel %vm762_vm12, %v761_v20, %v630_v45 }
 0x178   : > { %v703_v23 = vadd.f32 %v702_v17, %v701_v12  ;;  %v709_v24 = vadd.f32 %v708_v18, %v707_v13  ;;  %v766_v37 = vsel %vm765_vm13, %v763_v27, %v647_v25  ;;  %v767_v38 = vsel %vm765_vm13, %v764_v28, %v648_v26 }
 0x17a   : > { %v704_v29 = vrot.slane %v703_v23, 1  ;;  %v710_v30 = vrot.slane %v709_v24, 1 }
 0x17c   : > { %v705_v35 = vadd.f32 %v704_v29, %v703_v23  ;;  %v711_v36 = vadd.f32 %v710_v30, %v709_v24 }
 0x17e   : > { %v768_v39 = vsel %vm369_vm0, %v766_v37, %v705_v35  ;;  %v769_v43 = vsel %vm369_vm0, %v767_v38, %v711_v36 }
 0x17f   : > { %v771_v4 = vsel %vm770_vm14, %v768_v39, %v755_v33  ;;  %v772_v48 = vsel %vm770_vm14, %v769_v43, %v756_v34 }
 0x180   : > { %v774_v5 = vsel %vm773_vm15, %v771_v4, %v739_v31  ;;  %v775_v0 = vsel %vm773_vm15, %v772_v48, %v740_v32 }
 0x181   : > { %v777_v50 = vsel %vm776_vm1, %v774_v5, %v757_v44  ;;  %v778_v40 = vsel %vm776_vm1, %v775_v0, %v758_v47 }
 0x182   : > { %779 = vst [vmem:[%s280_s19] sm:$0xff] %v777_v50 }
 0x183   : > { %780 = vst [vmem:[%s280_s19 + $0x8] sm:$0xff] %v778_v40 }
 0x184 PF: > { %s23_s22 = sadd.s32 1, %s948_s22  }
 0x185   : > { %p20_p6 = scmp.ge.s32.totalorder %s23_s22, 4  }
 0x187   :  { %22 = sbr.rel (!%p20_p6) target bundleno = 7 (0x7), region = 75 }

</bundles_post_ra>
